<compile_context>
chip_gen: v5e
topology: v5e:2x2
jax: 0.10.0
libtpu: 0.0.40
codegen_flags: <defaults>
</compile_context>

<pallas_src>
import functools

import jax
import jax.numpy as jnp
from jax.experimental import pallas as pl
from jax.experimental.pallas import tpu as pltpu

LANE = 128      # lane width / padded feature dim
SUBLANE = 8     # sublane granularity


def _round_up(n, m):
    return (n + m - 1) // m * m


# ---------------------------------------------------------------------------
# Kernel: full MLP hot path on one batch tile, all parameters in one slab.
# ---------------------------------------------------------------------------
def metrics_mlp_kernel(x_ref, slab_ref, out_ref, *, num_linear):
    h = x_ref[...]                                   # (Btile, 128) f32
    bias_base = num_linear * LANE
    for i in range(num_linear):
        w = slab_ref[i * LANE:(i + 1) * LANE, :]                  # (128, 128)
        b = slab_ref[bias_base + i: bias_base + i + 1, :]         # (1, 128)
        h = jnp.dot(h, w, preferred_element_type=jnp.float32) + b
        if i < num_linear - 1:
            h = jnp.tanh(h)                          # EUP; padded cols stay 0
    out_ref[...] = h.astype(out_ref.dtype)           # lane-dense store


# ---------------------------------------------------------------------------
# Parameter packing: weights padded to (128,128) blocks, biases in one
# trailing (8,128) block (row i = bias of layer i).
# ---------------------------------------------------------------------------
def pack_params(params):
    num_linear = len(params)
    rows = num_linear * LANE + SUBLANE
    slab = jnp.zeros((rows, LANE), dtype=jnp.float32)
    for i, (w, b) in enumerate(params):
        din, dout = w.shape
        slab = slab.at[i * LANE:i * LANE + din, :dout].set(w)
        slab = slab.at[num_linear * LANE + i, :dout].set(b.reshape(-1))
    return slab


# ---------------------------------------------------------------------------
# Wrapper: pad x to lane width, tile the batch, call the kernel once,
# do get_par() in plain JAX.
# ---------------------------------------------------------------------------
def metrics_forward(x, slab, par, *, num_linear, m_p, bound=0.001,
                    batch_tile=8):
    B, d_in = x.shape
    B_pad = _round_up(max(B, batch_tile), batch_tile)
    x_pad = jnp.zeros((B_pad, LANE), jnp.float32).at[:B, :d_in].set(x)

    grid = (B_pad // batch_tile,)
    actions_pad = pl.pallas_call(
        functools.partial(metrics_mlp_kernel, num_linear=num_linear),
        out_shape=jax.ShapeDtypeStruct((B_pad, LANE), jnp.float32),
        grid=grid,
        in_specs=[
            # activations stream per batch tile
            pl.BlockSpec((batch_tile, LANE), lambda i: (i, 0)),
            # single parameter slab, constant index -> stays VMEM-resident
            pl.BlockSpec(slab.shape, lambda i: (0, 0)),
        ],
        out_specs=pl.BlockSpec((batch_tile, LANE), lambda i: (i, 0)),
        compiler_params=pltpu.CompilerParams(
            dimension_semantics=("parallel",)),
    )(x_pad, slab)

    actions = actions_pad[:B, :m_p]

    # get_par(): tiny scalar post-processing, hoisted out of the kernel.
    p = jnp.abs(par)
    e, q, s, lowp = p[0], p[1] + bound, p[2], p[3] + bound
    return actions, (e, q, s, lowp)


# ---------------------------------------------------------------------------
# Deterministic parameter construction (synthetic, no checkpoint).
# ---------------------------------------------------------------------------
def init_params(key, d_in, hidden, d_out, num_layers):
    dims = [d_in] + [hidden] * num_layers + [d_out]
    params = []
    for i in range(len(dims) - 1):
        key, kw, kb = jax.random.split(key, 3)
        lim = 1.0 / jnp.sqrt(dims[i])
        w = jax.random.uniform(kw, (dims[i], dims[i + 1]),
                               minval=-lim, maxval=lim, dtype=jnp.float32)
        b = jax.random.uniform(kb, (1, dims[i + 1]),
                               minval=-lim, maxval=lim, dtype=jnp.float32)
        params.append((w, b))
    return params


if __name__ == "__main__":
    # Synthetic dyn_sys: state_size=8, input_size=4, m_p=4
    STATE, INP, M_P = 8, 4, 4
    D_IN = STATE + INP
    HIDDEN = 64
    NUM_LAYERS = 4
    BATCH = 8
    BOUND = 0.001

    key = jax.random.PRNGKey(0)
    key, kx = jax.random.split(key)
    x = jax.random.normal(kx, (BATCH, D_IN), dtype=jnp.float32)

    params = init_params(key, D_IN, HIDDEN, M_P, NUM_LAYERS)
    par = jnp.array([0.1, 0.5, 30.0, 0.01], dtype=jnp.float32)  # self.par

    slab = pack_params(params)
    actions, (e, q, s, lowp) = metrics_forward(
        x, slab, par, num_linear=len(params), m_p=M_P, bound=BOUND)
    jax.block_until_ready((actions, e, q, s, lowp))

    # Pure-JAX reference check
    h = x
    for (w, b) in params[:-1]:
        h = jnp.tanh(h @ w + b)
    ref_actions = h @ params[-1][0] + params[-1][1]
    ref_abs = jnp.abs(par)
    ref_par = (ref_abs[0], ref_abs[1] + BOUND, ref_abs[2], ref_abs[3] + BOUND)

    assert jnp.allclose(actions, ref_actions, atol=1e-5, rtol=1e-5)
    assert jnp.allclose(jnp.stack([e, q, s, lowp]), jnp.stack(ref_par),
                        atol=1e-6, rtol=1e-6)

    print("KERNEL_OK")
</pallas_src>

<mosaic_0001>
module attributes {stable_mosaic.version = 11 : i64} {
  func.func @metrics_mlp_kernel(%arg0: i32, %arg1: memref<8x128xf32, #tpu.memory_space<vmem>>, %arg2: memref<648x128xf32, #tpu.memory_space<vmem>>, %arg3: memref<8x128xf32, #tpu.memory_space<vmem>>) attributes {dimension_semantics = [#tpu.dimension_semantics<parallel>], iteration_bounds = array<i64: 1>, scalar_prefetch = 0 : i64, scratch_operands = 0 : i64, tpu.core_type = #tpu.core_type<tc>, window_params = [{transform_indices = @transform_0, window_bounds = array<i64: 8, 128>}, {pipeline_mode = #tpu.pipeline_mode<synchronous>, transform_indices = @transform_1, window_bounds = array<i64: 648, 128>}, {transform_indices = @transform_2, window_bounds = array<i64: 8, 128>}]} {
    %c0 = arith.constant 0 : index
    %c0_0 = arith.constant 0 : index
    %0 = vector.load %arg1[%c0, %c0_0] : memref<8x128xf32, #tpu.memory_space<vmem>>, vector<8x128xf32>
    %c0_1 = arith.constant 0 : index
    %c0_2 = arith.constant 0 : index
    %1 = vector.load %arg2[%c0_1, %c0_2] : memref<648x128xf32, #tpu.memory_space<vmem>>, vector<128x128xf32>
    %c640 = arith.constant 640 : index
    %c0_3 = arith.constant 0 : index
    %2 = vector.load %arg2[%c640, %c0_3] : memref<648x128xf32, #tpu.memory_space<vmem>>, vector<1x128xf32>
    %cst = arith.constant dense<0.000000e+00> : vector<8x128xf32>
    %3 = tpu.matmul %0, %1, %cst {dimension_numbers = #tpu.dot_dimension_numbers<[1], [0], [0], [1], [0, 0, 1, 1], [], []>} : vector<8x128xf32>, vector<128x128xf32>, vector<8x128xf32> -> vector<8x128xf32>
    %4 = vector.broadcast %2 : vector<1x128xf32> to vector<8x128xf32>
    %5 = arith.addf %3, %4 : vector<8x128xf32>
    %6 = math.tanh %5 : vector<8x128xf32>
    %c128 = arith.constant 128 : index
    %c0_4 = arith.constant 0 : index
    %7 = vector.load %arg2[%c128, %c0_4] : memref<648x128xf32, #tpu.memory_space<vmem>>, vector<128x128xf32>
    %c641 = arith.constant 641 : index
    %c0_5 = arith.constant 0 : index
    %8 = vector.load %arg2[%c641, %c0_5] : memref<648x128xf32, #tpu.memory_space<vmem>>, vector<1x128xf32>
    %cst_6 = arith.constant dense<0.000000e+00> : vector<8x128xf32>
    %9 = tpu.matmul %6, %7, %cst_6 {dimension_numbers = #tpu.dot_dimension_numbers<[1], [0], [0], [1], [0, 0, 1, 1], [], []>} : vector<8x128xf32>, vector<128x128xf32>, vector<8x128xf32> -> vector<8x128xf32>
    %10 = vector.broadcast %8 : vector<1x128xf32> to vector<8x128xf32>
    %11 = arith.addf %9, %10 : vector<8x128xf32>
    %12 = math.tanh %11 : vector<8x128xf32>
    %c256 = arith.constant 256 : index
    %c0_7 = arith.constant 0 : index
    %13 = vector.load %arg2[%c256, %c0_7] : memref<648x128xf32, #tpu.memory_space<vmem>>, vector<128x128xf32>
    %c642 = arith.constant 642 : index
    %c0_8 = arith.constant 0 : index
    %14 = vector.load %arg2[%c642, %c0_8] : memref<648x128xf32, #tpu.memory_space<vmem>>, vector<1x128xf32>
    %cst_9 = arith.constant dense<0.000000e+00> : vector<8x128xf32>
    %15 = tpu.matmul %12, %13, %cst_9 {dimension_numbers = #tpu.dot_dimension_numbers<[1], [0], [0], [1], [0, 0, 1, 1], [], []>} : vector<8x128xf32>, vector<128x128xf32>, vector<8x128xf32> -> vector<8x128xf32>
    %16 = vector.broadcast %14 : vector<1x128xf32> to vector<8x128xf32>
    %17 = arith.addf %15, %16 : vector<8x128xf32>
    %18 = math.tanh %17 : vector<8x128xf32>
    %c384 = arith.constant 384 : index
    %c0_10 = arith.constant 0 : index
    %19 = vector.load %arg2[%c384, %c0_10] : memref<648x128xf32, #tpu.memory_space<vmem>>, vector<128x128xf32>
    %c643 = arith.constant 643 : index
    %c0_11 = arith.constant 0 : index
    %20 = vector.load %arg2[%c643, %c0_11] : memref<648x128xf32, #tpu.memory_space<vmem>>, vector<1x128xf32>
    %cst_12 = arith.constant dense<0.000000e+00> : vector<8x128xf32>
    %21 = tpu.matmul %18, %19, %cst_12 {dimension_numbers = #tpu.dot_dimension_numbers<[1], [0], [0], [1], [0, 0, 1, 1], [], []>} : vector<8x128xf32>, vector<128x128xf32>, vector<8x128xf32> -> vector<8x128xf32>
    %22 = vector.broadcast %20 : vector<1x128xf32> to vector<8x128xf32>
    %23 = arith.addf %21, %22 : vector<8x128xf32>
    %24 = math.tanh %23 : vector<8x128xf32>
    %c512 = arith.constant 512 : index
    %c0_13 = arith.constant 0 : index
    %25 = vector.load %arg2[%c512, %c0_13] : memref<648x128xf32, #tpu.memory_space<vmem>>, vector<128x128xf32>
    %c644 = arith.constant 644 : index
    %c0_14 = arith.constant 0 : index
    %26 = vector.load %arg2[%c644, %c0_14] : memref<648x128xf32, #tpu.memory_space<vmem>>, vector<1x128xf32>
    %cst_15 = arith.constant dense<0.000000e+00> : vector<8x128xf32>
    %27 = tpu.matmul %24, %25, %cst_15 {dimension_numbers = #tpu.dot_dimension_numbers<[1], [0], [0], [1], [0, 0, 1, 1], [], []>} : vector<8x128xf32>, vector<128x128xf32>, vector<8x128xf32> -> vector<8x128xf32>
    %28 = vector.broadcast %26 : vector<1x128xf32> to vector<8x128xf32>
    %29 = arith.addf %27, %28 : vector<8x128xf32>
    %c0_16 = arith.constant 0 : index
    %c0_17 = arith.constant 0 : index
    %30 = vector.load %arg3[%c0_16, %c0_17] : memref<8x128xf32, #tpu.memory_space<vmem>>, vector<8x128xf32>
    tpu.vector_store %arg3[%c0_16, %c0_17], %29 {strides = array<i32>} : memref<8x128xf32, #tpu.memory_space<vmem>>, vector<8x128xf32>,
    return
  }
  func.func @transform_0(%arg0: i32) -> (i32, i32) {
    %c0_i32 = arith.constant 0 : i32
    %c0_i32_0 = arith.constant 0 : i32
    return %arg0, %c0_i32 : i32, i32
  }
  func.func @transform_1(%arg0: i32) -> (i32, i32) {
    %c0_i32 = arith.constant 0 : i32
    %c0_i32_0 = arith.constant 0 : i32
    %c0_i32_1 = arith.constant 0 : i32
    return %c0_i32, %c0_i32_0 : i32, i32
  }
  func.func @transform_2(%arg0: i32) -> (i32, i32) {
    %c0_i32 = arith.constant 0 : i32
    %c0_i32_0 = arith.constant 0 : i32
    return %arg0, %c0_i32 : i32, i32
  }
}

</mosaic_0001>

<bundles_post_ra>
// kernel: tpu_custom_call.1
= control target key start
LH: loop header
LB: loop body
LE: loop exit
PB: predicated region body
PF: predicated region fallthrough
CT: control target
= control target key end

     0   :  { %7 = vsyncpa [#allocation3], 0  ;;  %s381_s0 = inlined_call_operand.hbm [shape: f32[8,128], index: 0, kind: input, shape index: {}]   ;;  %s382_s1 = inlined_call_operand.hbm [shape: f32[648,128], index: 1, kind: input, shape index: {}]   ;;  %s383_s2 = inlined_call_operand.hbm [shape: f32[8,128], index: 2, kind: output, shape index: {}]  }
   0x1   :  { %8 = vsyncpa [#allocation6], 0 }
   0x2   :  { %9 = vsyncpa [#allocation4], 0  ;;  %s15_s11 = sshll.u32 %s381_s0, 4  ;;  %s352_s12 = smov [#allocation2]   ;;  %s16_s11 = int_to_ptr.hbm [resolvable:$true] %s15_s11 }
   0x3   :  { %s17_s13 = sshll.u32 %s352_s12, 4  ;;  %s25_s16 = sshll.u32 %s382_s1, 4  ;;  %s18_s13 = int_to_ptr.vmem [resolvable:$true] %s17_s13  ;;  %s26_s16 = int_to_ptr.hbm [resolvable:$true] %s25_s16 }
   0x4   :  { %20 = dma.hbm_to_vmem [thread:$0]  %s16_s11, 128, %s18_s13, [#allocation3]  }
   0x5   :  { %s353_s17 = smov [#allocation5]   ;;  %s354_s19 = smov 128  }
   0x6   :  { %s27_s18 = sshll.u32 %s353_s17, 4  ;;  %s355_s20 = smov 8   ;;  %s28_s18 = int_to_ptr.vmem [resolvable:$true] %s27_s18 }
   0x7   :  { %33 = dma.hbm_to_vmem [thread:$0]  %s26_s16, 10368, %s28_s18, [#allocation6], %s354_s19, %s354_s19, %s355_s20  }
   0x8   :  { %346 = dma.done.wait [#allocation3], 128  }
   0x9   :  { %347 = vsyncadd [#allocation3], 4294967168 }
   0xa   :  { %348 = dma.done.wait [#allocation6], 10368  }
   0xb   :  { %349 = vsyncadd [#allocation6], 4294956928  ;;  %v58_v0 = vld [vmem:[#allocation5 + $0x78] sm:$0xff]  ;;  %v57_v1 = vld [vmem:[#allocation5 + $0x70] sm:$0xff]  ;;  %s356_s0 = smov [#allocation7]   ;;  %s245_s23 = sshll.u32 %s383_s2, 4  ;;  %s246_s23 = int_to_ptr.hbm [resolvable:$true] %s245_s23 }
   0xc   :  { %61 = vmatpush.msra.mxu0 %v58_v0  ;;  %v56_v2 = vld [vmem:[#allocation5 + $0x68] sm:$0xff]  ;;  %v55_v3 = vld [vmem:[#allocation5 + $0x60] sm:$0xff]  ;;  %v97_v4 = vld [vmem:[#allocation5 + $0xf8] sm:$0xff]  ;;  %s243_s1 = sshll.u32 %s356_s0, 4  ;;  %s244_s1 = int_to_ptr.vmem [resolvable:$true] %s243_s1 }
   0xd   :  { %v54_v5 = vld [vmem:[#allocation5 + $0x58] sm:$0xff]  ;;  %100 = vmatpush.msra.mxu1 %v97_v4  ;;  %v96_v6 = vld [vmem:[#allocation5 + $0xf0] sm:$0xff]  ;;  %v95_v7 = vld [vmem:[#allocation5 + $0xe8] sm:$0xff] }
   0xe   :  { %62 = vmatpush.msra.mxu0 %v57_v1  ;;  %v53_v8 = vld [vmem:[#allocation5 + $0x50] sm:$0xff]  ;;  %v52_v9 = vld [vmem:[#allocation5 + $0x48] sm:$0xff]  ;;  %v94_v10 = vld [vmem:[#allocation5 + $0xe0] sm:$0xff] }
   0xf   :  { %101 = vmatpush.msra.mxu1 %v96_v6  ;;  %v93_v11 = vld [vmem:[#allocation5 + $0xd8] sm:$0xff]  ;;  %v51_v12 = vld [vmem:[#allocation5 + $0x40] sm:$0xff]  ;;  %v92_v13 = vld [vmem:[#allocation5 + $0xd0] sm:$0xff] }
  0x10   :  { %63 = vmatpush.msra.mxu0 %v56_v2  ;;  %v50_v14 = vld [vmem:[#allocation5 + $0x38] sm:$0xff]  ;;  %v91_v15 = vld [vmem:[#allocation5 + $0xc8] sm:$0xff]  ;;  %v49_v16 = vld [vmem:[#allocation5 + $0x30] sm:$0xff] }
  0x11   :  { %102 = vmatpush.msra.mxu1 %v95_v7  ;;  %v90_v17 = vld [vmem:[#allocation5 + $0xc0] sm:$0xff]  ;;  %v48_v18 = vld [vmem:[#allocation5 + $0x28] sm:$0xff]  ;;  %v89_v19 = vld [vmem:[#allocation5 + $0xb8] sm:$0xff] }
  0x12   :  { %64 = vmatpush.msra.mxu0 %v55_v3  ;;  %v47_v20 = vld [vmem:[#allocation5 + $0x20] sm:$0xff]  ;;  %v88_v21 = vld [vmem:[#allocation5 + $0xb0] sm:$0xff]  ;;  %v46_v22 = vld [vmem:[#allocation5 + $0x18] sm:$0xff] }
  0x13   :  { %103 = vmatpush.msra.mxu1 %v94_v10  ;;  %v87_v23 = vld [vmem:[#allocation5 + $0xa8] sm:$0xff]  ;;  %v45_v24 = vld [vmem:[#allocation5 + $0x10] sm:$0xff]  ;;  %v43_v26 = vld [vmem:[#allocation5] sm:$0xff] }
  0x14   :  { %65 = vmatpush.msra.mxu0 %v54_v5  ;;  %v44_v25 = vld [vmem:[#allocation5 + $0x8] sm:$0xff]  ;;  %v42_v27 = vld [vmem:[#allocation2] sm:$0xff]  ;;  %v86_v28 = vld [vmem:[#allocation5 + $0xa0] sm:$0xff] }
  0x15   :  { %104 = vmatpush.msra.mxu1 %v93_v11  ;;  %v85_v29 = vld [vmem:[#allocation5 + $0x98] sm:$0xff]  ;;  %v84_v30 = vld [vmem:[#allocation5 + $0x90] sm:$0xff]  ;;  %v83_v31 = vld [vmem:[#allocation5 + $0x88] sm:$0xff] }
  0x16   :  { %66 = vmatpush.msra.mxu0 %v53_v8  ;;  %v82_v32 = vld [vmem:[#allocation5 + $0x80] sm:$0xff]  ;;  %v136_v33 = vld [vmem:[#allocation5 + $0x178] sm:$0xff]  ;;  %v135_v34 = vld [vmem:[#allocation5 + $0x170] sm:$0xff] }
  0x17   :  { %105 = vmatpush.msra.mxu1 %v92_v13  ;;  %139 = vmatpush.msra.mxu2 %v136_v33  ;;  %v134_v35 = vld [vmem:[#allocation5 + $0x168] sm:$0xff]  ;;  %v133_v36 = vld [vmem:[#allocation5 + $0x160] sm:$0xff]  ;;  %v132_v37 = vld [vmem:[#allocation5 + $0x158] sm:$0xff] }
  0x18   :  { %67 = vmatpush.msra.mxu0 %v52_v9  ;;  %v131_v38 = vld [vmem:[#allocation5 + $0x150] sm:$0xff]  ;;  %v130_v39 = vld [vmem:[#allocation5 + $0x148] sm:$0xff]  ;;  %v129_v40 = vld [vmem:[#allocation5 + $0x140] sm:$0xff] }
  0x19   :  { %106 = vmatpush.msra.mxu1 %v91_v15  ;;  %140 = vmatpush.msra.mxu2 %v135_v34  ;;  %v128_v41 = vld [vmem:[#allocation5 + $0x138] sm:$0xff]  ;;  %v127_v42 = vld [vmem:[#allocation5 + $0x130] sm:$0xff]  ;;  %v126_v43 = vld [vmem:[#allocation5 + $0x128] sm:$0xff] }
  0x1a   :  { %68 = vmatpush.msra.mxu0 %v51_v12  ;;  %v261_v44 = vld [vmem:[#allocation5 + $0x280] ss:$0 sm:$0xff]  ;;  %v124_v49 = vld [vmem:[#allocation5 + $0x118] sm:$0xff]  ;;  %v123_v50 = vld [vmem:[#allocation5 + $0x110] sm:$0xff] }
  0x1b   :  { %107 = vmatpush.msra.mxu1 %v90_v17  ;;  %141 = vmatpush.msra.mxu2 %v134_v35  ;;  %v125_v48 = vld [vmem:[#allocation5 + $0x120] sm:$0xff]  ;;  %v122_v51 = vld [vmem:[#allocation5 + $0x108] sm:$0xff]  ;;  %v175_v53 = vld [vmem:[#allocation5 + $0x1f8] sm:$0xff] }
  0x1c   :  { %69 = vmatpush.msra.mxu0 %v50_v14  ;;  %v121_v52 = vld [vmem:[#allocation5 + $0x100] sm:$0xff]  ;;  %v174_v54 = vld [vmem:[#allocation5 + $0x1f0] sm:$0xff]  ;;  %178 = vmatpush.msra.mxu3 %v175_v53  ;;  %v173_v55 = vld [vmem:[#allocation5 + $0x1e8] sm:$0xff] }
  0x1d   :  { %108 = vmatpush.msra.mxu1 %v89_v19  ;;  %142 = vmatpush.msra.mxu2 %v133_v36  ;;  %v172_v56 = vld [vmem:[#allocation5 + $0x1e0] sm:$0xff]  ;;  %v171_v57 = vld [vmem:[#allocation5 + $0x1d8] sm:$0xff]  ;;  %v170_v58 = vld [vmem:[#allocation5 + $0x1d0] sm:$0xff] }
  0x1e   :  { %70 = vmatpush.msra.mxu0 %v49_v16  ;;  %179 = vmatpush.msra.mxu3 %v174_v54  ;;  %v169_v59 = vld [vmem:[#allocation5 + $0x1c8] sm:$0xff]  ;;  %v168_v60 = vld [vmem:[#allocation5 + $0x1c0] sm:$0xff]  ;;  %v167_v61 = vld [vmem:[#allocation5 + $0x1b8] sm:$0xff] }
  0x1f   :  { %109 = vmatpush.msra.mxu1 %v88_v21  ;;  %143 = vmatpush.msra.mxu2 %v132_v37  ;;  %v166_v62 = vld [vmem:[#allocation5 + $0x1b0] sm:$0xff]  ;;  %v165_v63 = vld [vmem:[#allocation5 + $0x1a8] sm:$0xff]  ;;  %v262_v0 = vld [vmem:[#allocation5 + $0x281] ss:$0 sm:$0xff] }
  0x20   :  { %71 = vmatpush.msra.mxu0 %v48_v18  ;;  %180 = vmatpush.msra.mxu3 %v173_v55  ;;  %v164_v4 = vld [vmem:[#allocation5 + $0x1a0] sm:$0xff]  ;;  %v163_v5 = vld [vmem:[#allocation5 + $0x198] sm:$0xff]  ;;  %v162_v6 = vld [vmem:[#allocation5 + $0x190] sm:$0xff] }
  0x21   :  { %110 = vmatpush.msra.mxu1 %v87_v23  ;;  %144 = vmatpush.msra.mxu2 %v131_v38  ;;  %v161_v7 = vld [vmem:[#allocation5 + $0x188] sm:$0xff]  ;;  %v160_v8 = vld [vmem:[#allocation5 + $0x180] sm:$0xff]  ;;  %v214_v9 = vld [vmem:[#allocation5 + $0x278] sm:$0xff] }
  0x22   :  { %72 = vmatpush.msra.mxu0 %v47_v20  ;;  %181 = vmatpush.msra.mxu3 %v172_v56  ;;  %v213_v10 = vld [vmem:[#allocation5 + $0x270] sm:$0xff]  ;;  %v212_v11 = vld [vmem:[#allocation5 + $0x268] sm:$0xff]  ;;  %v211_v12 = vld [vmem:[#allocation5 + $0x260] sm:$0xff] }
  0x23   :  { %111 = vmatpush.msra.mxu1 %v86_v28  ;;  %145 = vmatpush.msra.mxu2 %v130_v39  ;;  %v210_v13 = vld [vmem:[#allocation5 + $0x258] sm:$0xff]  ;;  %v209_v14 = vld [vmem:[#allocation5 + $0x250] sm:$0xff]  ;;  %v208_v15 = vld [vmem:[#allocation5 + $0x248] sm:$0xff] }
  0x24   :  { %73 = vmatpush.msra.mxu0 %v46_v22  ;;  %182 = vmatpush.msra.mxu3 %v171_v57  ;;  %v207_v16 = vld [vmem:[#allocation5 + $0x240] sm:$0xff]  ;;  %v206_v17 = vld [vmem:[#allocation5 + $0x238] sm:$0xff]  ;;  %v205_v18 = vld [vmem:[#allocation5 + $0x230] sm:$0xff] }
  0x25   :  { %112 = vmatpush.msra.mxu1 %v85_v29  ;;  %146 = vmatpush.msra.mxu2 %v129_v40  ;;  %v204_v19 = vld [vmem:[#allocation5 + $0x228] sm:$0xff]  ;;  %v263_v20 = vld [vmem:[#allocation5 + $0x282] ss:$0 sm:$0xff]  ;;  %v264_v29 = vld [vmem:[#allocation5 + $0x283] ss:$0 sm:$0xff] }
  0x26   :  { %74 = vmatpush.msra.mxu0 %v45_v24  ;;  %183 = vmatpush.msra.mxu3 %v170_v58  ;;  %v203_v24 = vld [vmem:[#allocation5 + $0x220] sm:$0xff] }
  0x27   :  { %113 = vmatpush.msra.mxu1 %v84_v30  ;;  %147 = vmatpush.msra.mxu2 %v128_v41  ;;  %v199_v28 = vld [vmem:[#allocation5 + $0x200] sm:$0xff] }
  0x28   :  { %75 = vmatpush.msra.mxu0 %v44_v25  ;;  %184 = vmatpush.msra.mxu3 %v169_v59  ;;  %v202_v25 = vld [vmem:[#allocation5 + $0x218] sm:$0xff]  ;;  %v265_v33 = vld [vmem:[#allocation5 + $0x284] ss:$0 sm:$0xff] }
  0x29   :  { %114 = vmatpush.msra.mxu1 %v83_v31  ;;  %148 = vmatpush.msra.mxu2 %v127_v42 }
  0x2a   :  { %76 = vmatpush.msra.mxu0 %v43_v26  ;;  %185 = vmatpush.msra.mxu3 %v168_v60  ;;  %v201_v26 = vld [vmem:[#allocation5 + $0x210] sm:$0xff] }
  0x2b   :  { %77 = vmatmul.f32.vlgmr.msra.gmra.mxu0 %v42_v27  ;;  %115 = vmatpush.msra.mxu1 %v82_v32  ;;  %v200_v27 = vld [vmem:[#allocation5 + $0x208] sm:$0xff] }
  0x2c   :  { %149 = vmatpush.msra.mxu2 %v126_v43  ;;  %186 = vmatpush.msra.mxu3 %v167_v61 }
  0x2d   :  { %217 = vmatpush.msrb.mxu0 %v214_v9 }
  0x2e   :  { %150 = vmatpush.msra.mxu2 %v125_v48  ;;  %187 = vmatpush.msra.mxu3 %v166_v62 }
  0x2f   :  { %218 = vmatpush.msrb.mxu0 %v213_v10 }
  0x30   :  { %151 = vmatpush.msra.mxu2 %v124_v49  ;;  %188 = vmatpush.msra.mxu3 %v165_v63 }
  0x31   :  { %219 = vmatpush.msrb.mxu0 %v212_v11 }
  0x32   :  { %152 = vmatpush.msra.mxu2 %v123_v50  ;;  %189 = vmatpush.msra.mxu3 %v164_v4 }
  0x33   :  { %220 = vmatpush.msrb.mxu0 %v211_v12 }
  0x34   :  { %153 = vmatpush.msra.mxu2 %v122_v51  ;;  %190 = vmatpush.msra.mxu3 %v163_v5 }
  0x35   :  { %221 = vmatpush.msrb.mxu0 %v210_v13 }
  0x36   :  { %154 = vmatpush.msra.mxu2 %v121_v52  ;;  %191 = vmatpush.msra.mxu3 %v162_v6 }
  0x37   :  { %222 = vmatpush.msrb.mxu0 %v209_v14 }
  0x38   :  { %192 = vmatpush.msra.mxu3 %v161_v7 }
  0x39   :  { %223 = vmatpush.msrb.mxu0 %v208_v15 }
  0x3a   :  { %193 = vmatpush.msra.mxu3 %v160_v8 }
  0x3b   :  { %224 = vmatpush.msrb.mxu0 %v207_v16 }
  0x3d   :  { %225 = vmatpush.msrb.mxu0 %v206_v17 }
  0x3f   :  { %226 = vmatpush.msrb.mxu0 %v205_v18 }
  0x41   :  { %227 = vmatpush.msrb.mxu0 %v204_v19 }
  0x43   :  { %228 = vmatpush.msrb.mxu0 %v203_v24 }
  0x45   :  { %229 = vmatpush.msrb.mxu0 %v202_v25 }
  0x47   :  { %230 = vmatpush.msrb.mxu0 %v201_v26 }
  0x49   :  { %231 = vmatpush.msrb.mxu0 %v200_v27 }
  0x4b   :  { %232 = vmatpush.msrb.mxu0 %v199_v28 }
  0xa8   :  { %v78_v45 = vpop.f32.mrf.mxu0 }
  0xa9   :  { %v79_v46 = vadd.f32 %v261_v44, %v78_v45 }
  0xab   :  { %266 = vtanh.f32 %v79_v46 }
  0xb1   :  { %v267_v47 = vpop.eup %266 }
  0xb2   :  { %116 = vmatmul.f32.vlgmr.msra.gmra.mxu1 %v267_v47 }
 0x12f   :  { %v117_v1 = vpop.f32.mrf.mxu1 }
 0x130   :  { %v118_v2 = vadd.f32 %v262_v0, %v117_v1 }
 0x132   :  { %268 = vtanh.f32 %v118_v2 }
 0x138   :  { %v269_v3 = vpop.eup %268 }
 0x139   :  { %155 = vmatmul.f32.vlgmr.msra.gmra.mxu2 %v269_v3 }
 0x1bc   :  { %v156_v21 = vpop.f32.mrf.mxu2 }
 0x1bd   :  { %v157_v22 = vadd.f32 %v263_v20, %v156_v21 }
 0x1bf   :  { %270 = vtanh.f32 %v157_v22 }
 0x1c5   :  { %v271_v23 = vpop.eup %270 }
 0x1c6   :  { %194 = vmatmul.f32.vlgmr.msra.gmra.mxu3 %v271_v23 }
 0x249   :  { %v195_v30 = vpop.f32.mrf.mxu3 }
 0x24a   :  { %v196_v31 = vadd.f32 %v264_v29, %v195_v30 }
 0x24c   :  { %272 = vtanh.f32 %v196_v31 }
 0x252   :  { %v273_v32 = vpop.eup %272 }
 0x253   :  { %233 = vmatmul.f32.vlgmr.msrb.gmra.mxu0 %v273_v32 }
 0x2d0   :  { %v234_v34 = vpop.f32.mrf.mxu0 }
 0x2d1   :  { %v235_v35 = vadd.f32 %v265_v33, %v234_v34 }
 0x2d3   :  { %237 = vst [vmem:[#allocation7] sm:$0xff] %v235_v35 }
 0x2d4   :  { %248 = dma.vmem_to_hbm [thread:$0]  %s244_s1, 128, %s246_s23, [#allocation4]  }
 0x2d5   :  { %350 = dma.done.wait [#allocation4], 128  }
 0x2d6   :  { %351 = vsyncadd [#allocation4], 4294967168 }
 0x2d7   :  { %253 = vsyncpa [#allocation3], 1 }
 0x2d8   :  { %254 = vsyncpa [#allocation6], 1 }
 0x2d9   :  { %255 = vsyncpa [#allocation4], 1 }

</bundles_post_ra>
